<compile_context>
chip_gen: v6e
topology: v6e:2x2x1
jax: 0.10.0
libtpu: 0.0.40
codegen_flags: <defaults>
</compile_context>

<pallas_src>
import jax
import jax.numpy as jnp
from jax.experimental import pallas as pl
from jax.experimental.pallas import tpu as pltpu


def _round_up(x, m):
    return ((x + m - 1) // m) * m


def critic_kernel(state_ref, action_ref, w1s_ref, w1a_ref, b1_ref,
                  w2_ref, b2_ref, w3_ref, b3_ref, o_ref):
    # ---- layer1 (+ fused concat) + relu: MXU matmuls, f32 accumulation ----
    h1 = jnp.dot(state_ref[...], w1s_ref[...], preferred_element_type=jnp.float32)
    h1 = h1 + jnp.dot(action_ref[...], w1a_ref[...], preferred_element_type=jnp.float32)
    h1 = jnp.maximum(h1 + b1_ref[...], 0.0).astype(jnp.bfloat16)

    # ---- layer2 + relu ----
    h2 = jnp.dot(h1, w2_ref[...], preferred_element_type=jnp.float32)
    h2 = jnp.maximum(h2 + b2_ref[...], 0.0)

    # ---- layer3: N=1 matmul done as VPU multiply + lane (XLU) reduction ----
    q = jnp.sum(h2 * w3_ref[...], axis=-1, keepdims=True)
    o_ref[...] = (q + b3_ref[0, 0]).astype(o_ref.dtype)


def critic_forward(state, action, params):
    """state: (B, s_dim), action: (B, a_dim)  ->  (B, 1) Q-values (f32)."""
    w1s, w1a, b1, w2, b2, w3, b3 = params
    B, s_dim = state.shape
    a_dim = action.shape[1]
    H1 = w1s.shape[1]
    H2 = w2.shape[1]

    # Batch tiling: TB=128 fills the MXU LHS nicely for training-size batches;
    # for tiny batches just round B up to a sublane multiple (8).
    TB = 128 if B >= 128 else _round_up(B, 8)
    B_pad = _round_up(B, TB)
    if B_pad != B:
        pad = B_pad - B
        state = jnp.pad(state, ((0, pad), (0, 0)))
        action = jnp.pad(action, ((0, pad), (0, 0)))

    # bf16 inputs / bf16 weights, f32 accumulation inside the kernel.
    state = state.astype(jnp.bfloat16)
    action = action.astype(jnp.bfloat16)

    grid = (B_pad // TB,)

    out = pl.pallas_call(
        critic_kernel,
        out_shape=jax.ShapeDtypeStruct((B_pad, 1), jnp.float32),
        grid=grid,
        in_specs=[
            pl.BlockSpec((TB, s_dim), lambda i: (i, 0)),        # state tile
            pl.BlockSpec((TB, a_dim), lambda i: (i, 0)),        # action tile
            pl.BlockSpec((s_dim, H1), lambda i: (0, 0)),        # W1[:s_dim]  (resident)
            pl.BlockSpec((a_dim, H1), lambda i: (0, 0)),        # W1[s_dim:]  (resident)
            pl.BlockSpec((1, H1), lambda i: (0, 0)),            # b1
            pl.BlockSpec((H1, H2), lambda i: (0, 0)),           # W2          (resident)
            pl.BlockSpec((1, H2), lambda i: (0, 0)),            # b2
            pl.BlockSpec((1, H2), lambda i: (0, 0)),            # W3 row (f32)
            pl.BlockSpec(memory_space=pltpu.MemorySpace.SMEM),  # b3 scalar
        ],
        out_specs=pl.BlockSpec((TB, 1), lambda i: (i, 0)),
        compiler_params=pltpu.CompilerParams(
            dimension_semantics=("parallel",),  # v7x shards batch tiles across its 2 TCs
        ),
    )(state, action, w1s, w1a, b1, w2, b2, w3, b3)

    # TODO(synk): for tight RL loops at tiny batch, batch many (state, action)
    # evaluations per pallas_call (or pin weights across calls via cross-call
    # prefetch) to amortize the ~0.25 MB bf16 weight DMA, which dominates at B=8.
    return out[:B]


def init_critic_params(key, s_dim, a_dim):
    """Deterministic init matching the torch module's layer shapes.
    Weights stored as (in, out); W1 split into state/action halves (bf16),
    b1/b2 as (1, out) f32 rows, W3 as a (1, 300) f32 row, b3 as (1,1) f32."""
    in1, h1, h2, out = s_dim + a_dim, 400, 300, 1
    ks = jax.random.split(key, 6)

    def unif(k, shape, fan_in):
        bound = 1.0 / jnp.sqrt(float(fan_in))  # torch.nn.Linear default bound
        return jax.random.uniform(k, shape, jnp.float32, -bound, bound)

    w1 = unif(ks[0], (in1, h1), in1)
    b1 = unif(ks[1], (1, h1), in1)
    w2 = unif(ks[2], (h1, h2), h1)
    b2 = unif(ks[3], (1, h2), h1)
    w3 = unif(ks[4], (h2, out), h2)
    b3 = unif(ks[5], (1, out), h2)

    w1s = w1[:s_dim].astype(jnp.bfloat16)
    w1a = w1[s_dim:].astype(jnp.bfloat16)
    w2 = w2.astype(jnp.bfloat16)
    w3_row = w3.T.astype(jnp.float32)           # (1, 300) f32 row for VPU reduce
    b3 = b3.reshape(1, 1).astype(jnp.float32)   # SMEM scalar
    return (w1s, w1a, b1, w2, b2, w3_row, b3)


def critic_ref(state, action, params):
    """Pure-JAX reference mirroring the kernel's numerics (bf16 in, f32 acc)."""
    w1s, w1a, b1, w2, b2, w3, b3 = params
    s = state.astype(jnp.bfloat16)
    a = action.astype(jnp.bfloat16)
    h1 = (jnp.dot(s, w1s, preferred_element_type=jnp.float32)
          + jnp.dot(a, w1a, preferred_element_type=jnp.float32) + b1)
    h1 = jnp.maximum(h1, 0.0).astype(jnp.bfloat16)
    h2 = jnp.maximum(jnp.dot(h1, w2, preferred_element_type=jnp.float32) + b2, 0.0)
    return jnp.sum(h2 * w3, axis=-1, keepdims=True) + b3[0, 0]


if __name__ == "__main__":
    s_dim, a_dim, batch = 16, 8, 8
    key = jax.random.PRNGKey(0)
    k_state, k_action, k_params = jax.random.split(key, 3)

    state = jax.random.normal(k_state, (batch, s_dim), jnp.float32)
    action = jax.random.normal(k_action, (batch, a_dim), jnp.float32)
    params = init_critic_params(k_params, s_dim, a_dim)

    q = critic_forward(state, action, params)
    jax.block_until_ready(q)

    q_ref = critic_ref(state, action, params)
    assert q.shape == (batch, 1)
    assert jnp.allclose(q, q_ref, atol=2e-2, rtol=2e-2), (
        f"max abs err {jnp.max(jnp.abs(q - q_ref))}")

    print("KERNEL_OK")
</pallas_src>

<mosaic_0001>
module attributes {stable_mosaic.version = 11 : i64} {
  func.func @critic_kernel(%arg0: i32, %arg1: memref<8x16xbf16, #tpu.memory_space<vmem>>, %arg2: memref<8x8xbf16, #tpu.memory_space<vmem>>, %arg3: memref<16x400xbf16, #tpu.memory_space<vmem>>, %arg4: memref<8x400xbf16, #tpu.memory_space<vmem>>, %arg5: memref<1x400xf32, #tpu.memory_space<vmem>>, %arg6: memref<400x300xbf16, #tpu.memory_space<vmem>>, %arg7: memref<1x300xf32, #tpu.memory_space<vmem>>, %arg8: memref<1x300xf32, #tpu.memory_space<vmem>>, %arg9: memref<1x1xf32, #tpu.memory_space<smem>>, %arg10: memref<8x1xf32, #tpu.memory_space<vmem>>) attributes {dimension_semantics = [#tpu.dimension_semantics<parallel>], iteration_bounds = array<i64: 1>, scalar_prefetch = 0 : i64, scratch_operands = 0 : i64, tpu.core_type = #tpu.core_type<tc>, window_params = [{transform_indices = @transform_0, window_bounds = array<i64: 8, 16>}, {transform_indices = @transform_1, window_bounds = array<i64: 8, 8>}, {pipeline_mode = #tpu.pipeline_mode<synchronous>, transform_indices = @transform_2, window_bounds = array<i64: 16, 400>}, {pipeline_mode = #tpu.pipeline_mode<synchronous>, transform_indices = @transform_3, window_bounds = array<i64: 8, 400>}, {pipeline_mode = #tpu.pipeline_mode<synchronous>, transform_indices = @transform_4, window_bounds = array<i64: 1, 400>}, {pipeline_mode = #tpu.pipeline_mode<synchronous>, transform_indices = @transform_5, window_bounds = array<i64: 400, 300>}, {pipeline_mode = #tpu.pipeline_mode<synchronous>, transform_indices = @transform_6, window_bounds = array<i64: 1, 300>}, {pipeline_mode = #tpu.pipeline_mode<synchronous>, transform_indices = @transform_7, window_bounds = array<i64: 1, 300>}, {transform_indices = @transform_8, window_bounds = array<i64: 1, 1>}, {transform_indices = @transform_9, window_bounds = array<i64: 8, 1>}]} {
    %c0 = arith.constant 0 : index
    %c0_0 = arith.constant 0 : index
    %0 = vector.load %arg1[%c0, %c0_0] : memref<8x16xbf16, #tpu.memory_space<vmem>>, vector<8x16xbf16>
    %c0_1 = arith.constant 0 : index
    %c0_2 = arith.constant 0 : index
    %1 = vector.load %arg3[%c0_1, %c0_2] : memref<16x400xbf16, #tpu.memory_space<vmem>>, vector<16x400xbf16>
    %cst = arith.constant dense<0.000000e+00> : vector<8x400xf32>
    %2 = tpu.matmul %0, %1, %cst {dimension_numbers = #tpu.dot_dimension_numbers<[1], [0], [0], [1], [0, 0, 1, 1], [], []>} : vector<8x16xbf16>, vector<16x400xbf16>, vector<8x400xf32> -> vector<8x400xf32>
    %c0_3 = arith.constant 0 : index
    %c0_4 = arith.constant 0 : index
    %3 = vector.load %arg2[%c0_3, %c0_4] : memref<8x8xbf16, #tpu.memory_space<vmem>>, vector<8x8xbf16>
    %c0_5 = arith.constant 0 : index
    %c0_6 = arith.constant 0 : index
    %4 = vector.load %arg4[%c0_5, %c0_6] : memref<8x400xbf16, #tpu.memory_space<vmem>>, vector<8x400xbf16>
    %cst_7 = arith.constant dense<0.000000e+00> : vector<8x400xf32>
    %5 = tpu.matmul %3, %4, %cst_7 {dimension_numbers = #tpu.dot_dimension_numbers<[1], [0], [0], [1], [0, 0, 1, 1], [], []>} : vector<8x8xbf16>, vector<8x400xbf16>, vector<8x400xf32> -> vector<8x400xf32>
    %6 = arith.addf %2, %5 : vector<8x400xf32>
    %c0_8 = arith.constant 0 : index
    %c0_9 = arith.constant 0 : index
    %7 = vector.load %arg5[%c0_8, %c0_9] : memref<1x400xf32, #tpu.memory_space<vmem>>, vector<1x400xf32>
    %8 = vector.broadcast %7 : vector<1x400xf32> to vector<8x400xf32>
    %9 = arith.addf %6, %8 : vector<8x400xf32>
    %cst_10 = arith.constant 0.000000e+00 : f32
    %10 = vector.broadcast %cst_10 : f32 to vector<8x400xf32>
    %11 = arith.maximumf %9, %10 : vector<8x400xf32>
    %12 = arith.truncf %11 : vector<8x400xf32> to vector<8x400xbf16>
    %c0_11 = arith.constant 0 : index
    %c0_12 = arith.constant 0 : index
    %13 = vector.load %arg6[%c0_11, %c0_12] : memref<400x300xbf16, #tpu.memory_space<vmem>>, vector<400x300xbf16>
    %cst_13 = arith.constant dense<0.000000e+00> : vector<8x300xf32>
    %14 = tpu.matmul %12, %13, %cst_13 {dimension_numbers = #tpu.dot_dimension_numbers<[1], [0], [0], [1], [0, 0, 1, 1], [], []>} : vector<8x400xbf16>, vector<400x300xbf16>, vector<8x300xf32> -> vector<8x300xf32>
    %c0_14 = arith.constant 0 : index
    %c0_15 = arith.constant 0 : index
    %15 = vector.load %arg7[%c0_14, %c0_15] : memref<1x300xf32, #tpu.memory_space<vmem>>, vector<1x300xf32>
    %16 = vector.broadcast %15 : vector<1x300xf32> to vector<8x300xf32>
    %17 = arith.addf %14, %16 : vector<8x300xf32>
    %cst_16 = arith.constant 0.000000e+00 : f32
    %18 = vector.broadcast %cst_16 : f32 to vector<8x300xf32>
    %19 = arith.maximumf %17, %18 : vector<8x300xf32>
    %c0_17 = arith.constant 0 : index
    %c0_18 = arith.constant 0 : index
    %20 = vector.load %arg8[%c0_17, %c0_18] : memref<1x300xf32, #tpu.memory_space<vmem>>, vector<1x300xf32>
    %21 = vector.broadcast %20 : vector<1x300xf32> to vector<8x300xf32>
    %22 = arith.mulf %19, %21 : vector<8x300xf32>
    %cst_19 = arith.constant dense<0.000000e+00> : vector<8xf32>
    %23 = vector.multi_reduction <add>, %22, %cst_19 [1] : vector<8x300xf32> to vector<8xf32>
    %24 = vector.shape_cast %23 : vector<8xf32> to vector<8x1xf32>
    %c0_20 = arith.constant 0 : index
    %c0_21 = arith.constant 0 : index
    %25 = memref.load %arg9[%c0_20, %c0_21] : memref<1x1xf32, #tpu.memory_space<smem>>
    %26 = vector.broadcast %25 : f32 to vector<8x1xf32>
    %27 = arith.addf %24, %26 : vector<8x1xf32>
    %c0_22 = arith.constant 0 : index
    %c0_23 = arith.constant 0 : index
    %28 = vector.load %arg10[%c0_22, %c0_23] : memref<8x1xf32, #tpu.memory_space<vmem>>, vector<8x1xf32>
    tpu.vector_store %arg10[%c0_22, %c0_23], %27 {strides = array<i32>} : memref<8x1xf32, #tpu.memory_space<vmem>>, vector<8x1xf32>,
    return
  }
  func.func @transform_0(%arg0: i32) -> (i32, i32) {
    %c0_i32 = arith.constant 0 : i32
    %c0_i32_0 = arith.constant 0 : i32
    return %arg0, %c0_i32 : i32, i32
  }
  func.func @transform_1(%arg0: i32) -> (i32, i32) {
    %c0_i32 = arith.constant 0 : i32
    %c0_i32_0 = arith.constant 0 : i32
    return %arg0, %c0_i32 : i32, i32
  }
  func.func @transform_2(%arg0: i32) -> (i32, i32) {
    %c0_i32 = arith.constant 0 : i32
    %c0_i32_0 = arith.constant 0 : i32
    %c0_i32_1 = arith.constant 0 : i32
    return %c0_i32, %c0_i32_0 : i32, i32
  }
  func.func @transform_3(%arg0: i32) -> (i32, i32) {
    %c0_i32 = arith.constant 0 : i32
    %c0_i32_0 = arith.constant 0 : i32
    %c0_i32_1 = arith.constant 0 : i32
    return %c0_i32, %c0_i32_0 : i32, i32
  }
  func.func @transform_4(%arg0: i32) -> (i32, i32) {
    %c0_i32 = arith.constant 0 : i32
    %c0_i32_0 = arith.constant 0 : i32
    %c0_i32_1 = arith.constant 0 : i32
    return %c0_i32, %c0_i32_0 : i32, i32
  }
  func.func @transform_5(%arg0: i32) -> (i32, i32) {
    %c0_i32 = arith.constant 0 : i32
    %c0_i32_0 = arith.constant 0 : i32
    %c0_i32_1 = arith.constant 0 : i32
    return %c0_i32, %c0_i32_0 : i32, i32
  }
  func.func @transform_6(%arg0: i32) -> (i32, i32) {
    %c0_i32 = arith.constant 0 : i32
    %c0_i32_0 = arith.constant 0 : i32
    %c0_i32_1 = arith.constant 0 : i32
    return %c0_i32, %c0_i32_0 : i32, i32
  }
  func.func @transform_7(%arg0: i32) -> (i32, i32) {
    %c0_i32 = arith.constant 0 : i32
    %c0_i32_0 = arith.constant 0 : i32
    %c0_i32_1 = arith.constant 0 : i32
    return %c0_i32, %c0_i32_0 : i32, i32
  }
  func.func @transform_8(%arg0: i32) -> (i32, i32) {
    %c0_i32 = arith.constant 0 : i32
    %c0_i32_0 = arith.constant 0 : i32
    %c0_i32_1 = arith.constant 0 : i32
    return %c0_i32, %c0_i32_0 : i32, i32
  }
  func.func @transform_9(%arg0: i32) -> (i32, i32) {
    %c0_i32 = arith.constant 0 : i32
    %c0_i32_0 = arith.constant 0 : i32
    return %arg0, %c0_i32 : i32, i32
  }
}

</mosaic_0001>

<bundles_post_ra>
// kernel: tpu_custom_call.1
= control target key start
LH: loop header
LB: loop body
LE: loop exit
PB: predicated region body
PF: predicated region fallthrough
CT: control target
= control target key end

     0   :  { %15 = vsyncpa [#allocation4], 0  ;;  %s1543_s0 = inlined_call_operand.hbm [shape: bf16[8,16], index: 0, kind: input, shape index: {}]   ;;  %s1544_s1 = inlined_call_operand.hbm [shape: bf16[8,8], index: 1, kind: input, shape index: {}]   ;;  %s1545_s2 = inlined_call_operand.hbm [shape: bf16[16,400], index: 2, kind: input, shape index: {}]   ;;  %s1546_s3 = inlined_call_operand.hbm [shape: bf16[8,400], index: 3, kind: input, shape index: {}]   ;;  %s1547_s4 = inlined_call_operand.vmem [shape: f32[1,400], index: 4, kind: input, shape index: {}]   ;;  %s1548_s5 = inlined_call_operand.hbm [shape: bf16[400,300], index: 5, kind: input, shape index: {}]   ;;  %s1549_s6 = inlined_call_operand.vmem [shape: f32[1,300], index: 6, kind: input, shape index: {}]   ;;  %s1550_s7 = inlined_call_operand.vmem [shape: f32[1,300], index: 7, kind: input, shape index: {}]   ;;  %s1551_s8 = inlined_call_operand.<no memory space> [shape: f32[1,1], index: 8, kind: input, shape index: {}]   ;;  %s1552_s9 = inlined_call_operand.vmem [shape: f32[8,1], index: 9, kind: output, shape index: {}]  }
   0x1   :  { %16 = vsyncpa [#allocation6], 0 }
   0x2   :  { %17 = vsyncpa [#allocation9], 0  ;;  %s1415_s30 = smov [#allocation5]   ;;  %s1416_s11 = smov [#allocation8]  }
   0x3   :  { %s34_s10 = sshll.u32 %s1415_s30, 4  ;;  %s56_s12 = sshll.u32 %s1416_s11, 4  ;;  %s35_s10 = int_to_ptr.vmem [resolvable:$true] %s34_s10  ;;  %s57_s12 = int_to_ptr.vmem [resolvable:$true] %s56_s12 }
   0x4   :  { %s1317_s13 = scalar_lea.vmem %s35_s10, 64  ;;  %p1322_p1 = scmp.lt.s32.totalorder %s35_s10, %s35_s10 }
   0x5   :  { %p1318_p0 = scmp.ne.s32.totalorder %s35_s10, %s1317_s13  ;;  %p1323_p2 = scmp.lt.s32.totalorder %s1317_s13, %s1317_s13 }
   0x7   :  { %p1324_p3 = por %p1323_p2, %p1322_p1 }
   0x9   :  { %p1325_p4 = pnand %p1324_p3, %p1318_p0 }
   0xb   :  { %1328 = shalt.err (!%p1325_p4)
}
   0xc   :  { %37 = dma.hbm_to_vmem [thread:$0]  %s1544_s1, 64, %s35_s10, [#allocation6]  }
   0xd   :  { %s1337_s16 = scalar_lea.vmem %s57_s12, 256  ;;  %p1342_p6 = scmp.lt.s32.totalorder %s57_s12, %s57_s12 }
   0xe   :  { %p1338_p5 = scmp.ne.s32.totalorder %s57_s12, %s1337_s16  ;;  %p1343_p7 = scmp.lt.s32.totalorder %s1337_s16, %s1337_s16 }
  0x10   :  { %p1344_p8 = por %p1343_p7, %p1342_p6 }
  0x12   :  { %p1345_p9 = pnand %p1344_p8, %p1338_p5 }
  0x14   :  { %1348 = shalt.err (!%p1345_p9)
}
  0x15   :  { %59 = dma.hbm_to_vmem [thread:$0]  %s1546_s3, 256, %s57_s12, [#allocation9]  }
  0x16   :  { %s1417_s19 = smov [#allocation3]   ;;  %s1418_s21 = smov [#allocation7]  }
  0x17   :  { %s24_s20 = sshll.u32 %s1417_s19, 4  ;;  %s43_s22 = sshll.u32 %s1418_s21, 4  ;;  %s25_s20 = int_to_ptr.vmem [resolvable:$true] %s24_s20  ;;  %s44_s22 = int_to_ptr.vmem [resolvable:$true] %s43_s22 }
  0x18   :  { %s1357_s23 = scalar_lea.vmem %s25_s20, 64  ;;  %p1362_p11 = scmp.lt.s32.totalorder %s25_s20, %s25_s20 }
  0x19   :  { %p1358_p10 = scmp.ne.s32.totalorder %s25_s20, %s1357_s23  ;;  %p1363_p12 = scmp.lt.s32.totalorder %s1357_s23, %s1357_s23 }
  0x1b   :  { %p1364_p13 = por %p1363_p12, %p1362_p11 }
  0x1d   :  { %p1365_p0 = pnand %p1364_p13, %p1358_p10 }
  0x1f   :  { %1368 = shalt.err (!%p1365_p0)
}
  0x20   :  { %27 = dma.hbm_to_vmem [thread:$0]  %s1543_s0, 64, %s25_s20, [#allocation4]  }
  0x21   :  { %s1377_s25 = scalar_lea.vmem %s44_s22, 512  ;;  %p1382_p2 = scmp.lt.s32.totalorder %s44_s22, %s44_s22 }
  0x22   :  { %p1378_p1 = scmp.ne.s32.totalorder %s44_s22, %s1377_s25  ;;  %p1383_p3 = scmp.lt.s32.totalorder %s1377_s25, %s1377_s25 }
  0x24   :  { %p1384_p4 = por %p1383_p3, %p1382_p2 }
  0x26   :  { %p1385_p5 = pnand %p1384_p4, %p1378_p1 }
  0x28   :  { %1388 = shalt.err (!%p1385_p5)
}
  0x29   :  { %s1419_s3 = smov 256   ;;  %s1420_s26 = smov 16  }
  0x2a   :  { %49 = dma.hbm_to_vmem [thread:$0]  %s1545_s2, 512, %s44_s22, [#allocation6], %s1419_s3, %s1419_s3, %s1420_s26  }
  0x2b   :  { %s1421_s29 = smov [#allocation10]  }
  0x2c   :  { %s67_s30 = sshll.u32 %s1421_s29, 4  ;;  %s68_s30 = int_to_ptr.vmem [resolvable:$true] %s67_s30 }
  0x2d   :  { %s1397_s10 = scalar_lea.vmem %s68_s30, 9600  ;;  %p1402_p7 = scmp.lt.s32.totalorder %s68_s30, %s68_s30 }
  0x2e   :  { %p1398_p6 = scmp.ne.s32.totalorder %s68_s30, %s1397_s10  ;;  %p1403_p8 = scmp.lt.s32.totalorder %s1397_s10, %s1397_s10 }
  0x30   :  { %p1404_p9 = por %p1403_p8, %p1402_p7 }
  0x32   :  { %p1405_p10 = pnand %p1404_p9, %p1398_p6 }
  0x34   :  { %1408 = shalt.err (!%p1405_p10)
}
  0x35   :  { %s1422_s0 = smov 192   ;;  %s1423_s11 = smov 12  }
  0x36   :  { %73 = dma.hbm_to_vmem [thread:$0]  %s1548_s5, 9600, %s68_s30, [#allocation9], %s1422_s0, %s1422_s0, %s1423_s11  }
  0x37   :  { %1409 = dma.done.wait [#allocation4], 64  }
  0x38   :  { %1410 = vsyncadd [#allocation4], 4294967232 }
  0x39   :  { %1411 = dma.done.wait [#allocation6], 576  }
  0x3a   :  { %1412 = vsyncadd [#allocation6], 4294966720 }
  0x3b   :  { %1413 = dma.done.wait [#allocation9], 9856  }
  0x3c   :  { %1414 = vsyncadd [#allocation9], 4294957440  ;;  %v1424_v0 = vmov 0   ;;  %v102_v1 = vld [vmem:[#allocation8] sm:$0xff]  ;;  %vm118_vm0 = vcmask 1043456   ;;  %v103_v2 = vld [vmem:[#allocation8 + $0x8] sm:$0xff] }
  0x3d   :  { %163 = vmatprep.mubr.bf16.mxu1 %v1424_v0  ;;  %v1077_v3 = vcombine.high %v102_v1, %v102_v1  ;;  %v1076_v4 = vcombine.low %v102_v1, %v102_v1  ;;  %v1079_v5 = vcombine.high %v103_v2, %v103_v2  ;;  %v1078_v6 = vcombine.low %v103_v2, %v103_v2  ;;  %v101_v8 = vld [vmem:[#allocation5] sm:$0xf]  ;;  %v1205_v9 = vld [vmem:[#allocation7 + $0x4] ss:$16 sps:$4 sm:$0xff]   ;;  %v1214_v14 = vld [vmem:[#allocation10 + $0x90] ss:$12 sps:$4 sm:$0xff]  }
  0x3e   :  { %vm114_vm1 = vcmask 64512   ;;  %v1209_v10 = vld [vmem:[#allocation10 + $0xac] ss:$12 sps:$4 sm:$0xff]   ;;  %v1211_v12 = vld [vmem:[#allocation10 + $0xa8] ss:$12 sps:$4 sm:$0xff]   ;;  %vm233_vm2 = vcmask 130048  }
  0x3f   :  { %1080 = vmatprep.subr.msk.bf16.mxu1 %vm118_vm0, %v1077_v3  ;;  %v120_v7 = vsel %vm118_vm0, %v1076_v4, 0  ;;  %v126_v11 = vsel %vm118_vm0, %v1078_v6, 0  ;;  %873 = vmatprep.subr.bf16.mxu0 %v1209_v10  ;;  %v1212_v13 = vld [vmem:[#allocation10 + $0x94] ss:$12 sps:$4 sm:$0xff]   ;;  %v1215_v15 = vld [vmem:[#allocation10 + $0x7c] ss:$12 sps:$4 sm:$0xff]  }
  0x40   :  { %146 = vmatpush1.bf16.msra.mxu1 %v120_v7  ;;  %874 = vmatpush1.bf16.msra.mxu0 %v1211_v12  ;;  %v1203_v16 = vld [vmem:[#allocation7] ss:$16 sps:$4 sm:$0xff]   ;;  %v1217_v17 = vld [vmem:[#allocation10 + $0x78] ss:$12 sps:$4 sm:$0xff]   ;;  %v1208_v18 = vld [vmem:[#allocation7 + $0xc] ss:$16 sps:$4 sm:$0xff]  }
  0x41   :  { %1082 = vmatprep.subr.msk.bf16.mxu1 %vm118_vm0, %v1079_v5  ;;  %875 = vmatprep.subr.bf16.mxu0 %v1212_v13  ;;  %v1218_v19 = vld [vmem:[#allocation10 + $0x64] ss:$12 sps:$4 sm:$0xff]   ;;  %v1220_v20 = vld [vmem:[#allocation10 + $0x60] ss:$12 sps:$4 sm:$0xff]   ;;  %v96_v22 = vld [vmem:[#allocation3] sm:$0xf]  ;;  %v321_v5 = vlaneseq }
  0x42   :  { %v1221_v21 = vld [vmem:[#allocation10 + $0x4c] ss:$12 sps:$4 sm:$0xff]   ;;  %v1223_v24 = vld [vmem:[#allocation10 + $0x48] ss:$12 sps:$4 sm:$0xff]   ;;  %v1226_v27 = vld [vmem:[#allocation10 + $0x30] ss:$12 sps:$4 sm:$0xff]  }
  0x43   :  { %1081 = vmatmul.mubr.msk.bf16.vlgmr.msra.gmra.mxu1 %vm114_vm1, %v101_v8  ;;  %v1206_v23 = vld [vmem:[#allocation7 + $0x8] ss:$16 sps:$4 sm:$0xff]   ;;  %v1224_v25 = vld [vmem:[#allocation10 + $0x34] ss:$12 sps:$4 sm:$0xff]   ;;  %v1230_v30 = vld [vmem:[#allocation10 + $0x4] ss:$12 sps:$4 sm:$0xff]  }
  0x44   :  { %187 = vmatpush1.bf16.msra.mxu1 %v126_v11  ;;  %204 = vmatprep.mubr.bf16.mxu1 %v1424_v0  ;;  %v1240_v26 = vld [vmem:[#allocation10 + $0x22c] ss:$12 sps:$4 sm:$0xff]   ;;  %v1227_v28 = vld [vmem:[#allocation10 + $0x1c] ss:$12 sps:$4 sm:$0xff]   ;;  %v1236_v35 = vld [vmem:[#allocation10 + $0x154] ss:$12 sps:$4 sm:$0xff]  }
  0x45   :  { %251 = vmatprep.subr.bf16.mxu1 %v1205_v9  ;;  %876 = vmatpush1.bf16.msra.mxu0 %v1214_v14  ;;  %v1229_v29 = vld [vmem:[#allocation10 + $0x18] ss:$12 sps:$4 sm:$0xff]   ;;  %v1238_v31 = vld [vmem:[#allocation10 + $0x228] ss:$12 sps:$4 sm:$0xff]   ;;  %v1232_v32 = vld [vmem:[#allocation10] ss:$12 sps:$4 sm:$0xff]  }
  0x46   :  { %877 = vmatprep.subr.bf16.mxu0 %v1215_v15  ;;  %v1233_v33 = vld [vmem:[#allocation10 + $0x16c] ss:$12 sps:$4 sm:$0xff]   ;;  %v1235_v34 = vld [vmem:[#allocation10 + $0x168] ss:$12 sps:$4 sm:$0xff]   ;;  %v1241_v36 = vld [vmem:[#allocation10 + $0x150] ss:$12 sps:$4 sm:$0xff]  }
  0x47   :  { %v1242_v37 = vld [vmem:[#allocation10 + $0x13c] ss:$12 sps:$4 sm:$0xff]   ;;  %v1246_v38 = vld [vmem:[#allocation10 + $0x214] ss:$12 sps:$4 sm:$0xff]   ;;  %v1247_v40 = vld [vmem:[#allocation10 + $0x138] ss:$12 sps:$4 sm:$0xff]  }
  0x48   :  { %v1244_v39 = vld [vmem:[#allocation10 + $0x210] ss:$12 sps:$4 sm:$0xff]   ;;  %v1250_v43 = vld [vmem:[#allocation10 + $0x1f8] ss:$12 sps:$4 sm:$0xff]   ;;  %v1253_v44 = vld [vmem:[#allocation10 + $0x120] ss:$12 sps:$4 sm:$0xff]  }
  0x49   :  { %878 = vmatpush1.bf16.msra.mxu0 %v1217_v17  ;;  %v1248_v41 = vld [vmem:[#allocation10 + $0x124] ss:$12 sps:$4 sm:$0xff]   ;;  %v1252_v42 = vld [vmem:[#allocation10 + $0x1fc] ss:$12 sps:$4 sm:$0xff]   ;;  %v1254_v45 = vld [vmem:[#allocation10 + $0x10c] ss:$12 sps:$4 sm:$0xff]  }
  0x4a   :  { %879 = vmatprep.subr.bf16.mxu0 %v1218_v19  ;;  %v1258_v46 = vld [vmem:[#allocation10 + $0x1e4] ss:$12 sps:$4 sm:$0xff]   ;;  %v1256_v47 = vld [vmem:[#allocation10 + $0x1e0] ss:$12 sps:$4 sm:$0xff]   ;;  %v1259_v48 = vld [vmem:[#allocation10 + $0x108] ss:$12 sps:$4 sm:$0xff]  }
  0x4b   :  { %1083 = vmatmul.mubr.msk.bf16.vlgmr.msra.gmra.mxu1 %vm114_vm1, %v101_v8  ;;  %v1260_v49 = vld [vmem:[#allocation10 + $0xf4] ss:$12 sps:$4 sm:$0xff]   ;;  %v1264_v50 = vld [vmem:[#allocation10 + $0x1cc] ss:$12 sps:$4 sm:$0xff]   ;;  %v1265_v52 = vld [vmem:[#allocation10 + $0xf0] ss:$12 sps:$4 sm:$0xff]  }
  0x4c   :  { %252 = vmatpush1.bf16.msra.mxu1 %v1203_v16  ;;  %269 = vmatprep.mubr.bf16.mxu1 %v1424_v0  ;;  %v1262_v51 = vld [vmem:[#allocation10 + $0x1c8] ss:$12 sps:$4 sm:$0xff]   ;;  %v1268_v55 = vld [vmem:[#allocation10 + $0x1b0] ss:$12 sps:$4 sm:$0xff]   ;;  %v1271_v56 = vld [vmem:[#allocation10 + $0xd8] ss:$12 sps:$4 sm:$0xff]  }
  0x4d   :  { %292 = vmatprep.subr.bf16.mxu1 %v1208_v18  ;;  %880 = vmatpush1.bf16.msra.mxu0 %v1220_v20  ;;  %v1266_v53 = vld [vmem:[#allocation10 + $0xdc] ss:$12 sps:$4 sm:$0xff]   ;;  %v1270_v54 = vld [vmem:[#allocation10 + $0x1b4] ss:$12 sps:$4 sm:$0xff]   ;;  %v1272_v57 = vld [vmem:[#allocation10 + $0xc4] ss:$12 sps:$4 sm:$0xff]  }
  0x4e   :  { %881 = vmatprep.subr.bf16.mxu0 %v1221_v21  ;;  %v1276_v58 = vld [vmem:[#allocation10 + $0x19c] ss:$12 sps:$4 sm:$0xff]   ;;  %v1274_v59 = vld [vmem:[#allocation10 + $0x198] ss:$12 sps:$4 sm:$0xff]   ;;  %v1277_v60 = vld [vmem:[#allocation10 + $0xc0] ss:$12 sps:$4 sm:$0xff]  }
  0x4f   :  { %v1280_v61 = vld [vmem:[#allocation10 + $0x184] ss:$12 sps:$4 sm:$0xff]   ;;  %v1278_v62 = vld [vmem:[#allocation10 + $0x180] ss:$12 sps:$4 sm:$0xff]   ;;  %v322_v8 = vshrl.u32 %v321_v5, 7  ;;  %vm1059_vm3 = vcmask 359424  }
  0x50   :  { %v1284_v63 = vld [vmem:[#allocation10 + $0x244] ss:$12 sps:$4 sm:$0xff]   ;;  %v1282_v1 = vld [vmem:[#allocation10 + $0x240] ss:$12 sps:$4 sm:$0xff]   ;;  %v319_v13 = vld [vmem:[%s1547_s4] sm:$0xf] }
  0x51   :  { %882 = vmatpush1.bf16.msra.mxu0 %v1223_v24  ;;  %v1286_v2 = vld [vmem:[#allocation10 + $0x170] ss:$12 sps:$4 sm:$0xff]   ;;  %v1499_v11 = vsub.s32 0, %v322_v8  ;;  %v1504_v14 = vsub.s32 1, %v322_v8  ;;  %v1307_v5 = vld [vmem:[#allocation10 + $0xc8] ss:$12 sps:$4 sm:$0xff]  }
  0x52   :  { %883 = vmatprep.subr.bf16.mxu0 %v1224_v25  ;;  %v335_v25 = vsub.s32 3, %v322_v8  ;;  %vm1067_vm4 = vcmask 7168  }
  0x53   :  { %1088 = vmatmul.mubr.msk.bf16.vlgmr.msra.gmra.mxu1 %vm233_vm2, %v96_v22  ;;  %v324_v16 = vrot.slane %v319_v13, %v1499_v11  ;;  %v328_v19 = vrot.slane %v319_v13, %v1504_v14 }
  0x54   :  { %293 = vmatpush1.bf16.msra.mxu1 %v1206_v23  ;;  %310 = vmatprep.mubr.bf16.mxu1 %v1424_v0  ;;  %v1508_v23 = vsub.s32 2, %v322_v8 }
  0x55   :  { %914 = vmatprep.subr.bf16.mxu1 %v1240_v26  ;;  %884 = vmatpush1.bf16.msra.mxu0 %v1226_v27 }
  0x56   :  { %885 = vmatprep.subr.bf16.mxu0 %v1227_v28 }
  0x59   :  { %886 = vmatpush1.bf16.msra.mxu0 %v1229_v29  ;;  %v332_v29 = vrot.slane %v319_v13, %v1508_v23 }
  0x5a   :  { %887 = vmatprep.subr.bf16.mxu0 %v1230_v30 }
  0x5b   :  { %1089 = vmatmul.mubr.msk.bf16.vlgmr.msra.gmra.mxu1 %vm233_vm2, %v96_v22 }
  0x5c   :  { %915 = vmatpush1.bf16.msra.mxu1 %v1238_v31 }
  0x5d   :  { %888 = vmatpush1.bf16.msra.mxu0 %v1232_v32  ;;  %916 = vmatprep.subr.bf16.mxu1 %v1246_v38 }
  0x5e   :  { %889 = vmatprep.subr.bf16.mxu0 %v1233_v33  ;;  %v336_v33 = vrot.slane %v319_v13, %v335_v25 }
  0x60   :  { %917 = vmatpush1.bf16.msra.mxu1 %v1244_v39 }
  0x61   :  { %890 = vmatpush2.bf16.msra.mxu0 %v1235_v34  ;;  %918 = vmatprep.subr.bf16.mxu1 %v1252_v42  ;;  %v1285_v42 = vld [vmem:[#allocation10 + $0x218] ss:$12 sps:$4 sm:$0xff]  }
  0x62   :  { %891 = vmatprep.subr.bf16.mxu0 %v1236_v35  ;;  %v1281_v35 = vld [vmem:[#allocation10 + $0x230] ss:$12 sps:$4 sm:$0xff]  }
  0x64   :  { %919 = vmatpush1.bf16.msra.mxu1 %v1250_v43 }
  0x65   :  { %892 = vmatpush2.bf16.msra.mxu0 %v1241_v36  ;;  %920 = vmatprep.subr.bf16.mxu1 %v1258_v46 }
  0x66   :  { %893 = vmatprep.subr.bf16.mxu0 %v1242_v37 }
  0x68   :  { %921 = vmatpush1.bf16.msra.mxu1 %v1256_v47  ;;  %v1287_v47 = vld [vmem:[#allocation10 + $0xb0] ss:$12 sps:$4 sm:$0xff]  }
  0x69   :  { %894 = vmatpush2.bf16.msra.mxu0 %v1247_v40  ;;  %922 = vmatprep.subr.bf16.mxu1 %v1264_v50  ;;  %v1289_v50 = vld [vmem:[#allocation10 + $0x158] ss:$12 sps:$4 sm:$0xff]  }
  0x6a   :  { %895 = vmatprep.subr.bf16.mxu0 %v1248_v41 }
  0x6c   :  { %923 = vmatpush1.bf16.msra.mxu1 %v1262_v51  ;;  %v1290_v51 = vld [vmem:[#allocation10 + $0x98] ss:$12 sps:$4 sm:$0xff]  }
  0x6d   :  { %896 = vmatpush2.bf16.msra.mxu0 %v1253_v44  ;;  %924 = vmatprep.subr.bf16.mxu1 %v1270_v54  ;;  %v1293_v54 = vld [vmem:[#allocation10 + $0x80] ss:$12 sps:$4 sm:$0xff]  }
  0x6e   :  { %897 = vmatprep.subr.bf16.mxu0 %v1254_v45 }
  0x70   :  { %925 = vmatpush1.bf16.msra.mxu1 %v1268_v55  ;;  %v1294_v55 = vld [vmem:[#allocation10 + $0x1d0] ss:$12 sps:$4 sm:$0xff]  }
  0x71   :  { %898 = vmatpush2.bf16.msra.mxu0 %v1259_v48  ;;  %926 = vmatprep.subr.bf16.mxu1 %v1276_v58  ;;  %v1288_v48 = vld [vmem:[#allocation10 + $0x200] ss:$12 sps:$4 sm:$0xff]   ;;  %v1297_v58 = vld [vmem:[#allocation10 + $0x1b8] ss:$12 sps:$4 sm:$0xff]  }
  0x72   :  { %899 = vmatprep.subr.bf16.mxu0 %v1260_v49 }
  0x74   :  { %927 = vmatpush1.bf16.msra.mxu1 %v1274_v59  ;;  %v1298_v59 = vld [vmem:[#allocation10 + $0x110] ss:$12 sps:$4 sm:$0xff]  }
  0x75   :  { %900 = vmatpush2.bf16.msra.mxu0 %v1265_v52  ;;  %928 = vmatprep.subr.bf16.mxu1 %v1280_v61  ;;  %v1291_v52 = vld [vmem:[#allocation10 + $0x1e8] ss:$12 sps:$4 sm:$0xff]   ;;  %v1300_v61 = vld [vmem:[#allocation10 + $0x1a0] ss:$12 sps:$4 sm:$0xff]  }
  0x76   :  { %901 = vmatprep.subr.bf16.mxu0 %v1266_v53  ;;  %v1292_v53 = vld [vmem:[#allocation10 + $0x140] ss:$12 sps:$4 sm:$0xff]  }
  0x78   :  { %929 = vmatpush1.bf16.msra.mxu1 %v1278_v62  ;;  %v1301_v62 = vld [vmem:[#allocation10 + $0xf8] ss:$12 sps:$4 sm:$0xff]  }
  0x79   :  { %902 = vmatpush2.bf16.msra.mxu0 %v1271_v56  ;;  %944 = vmatprep.subr.bf16.mxu1 %v1284_v63  ;;  %v1295_v56 = vld [vmem:[#allocation10 + $0x128] ss:$12 sps:$4 sm:$0xff]   ;;  %v1302_v63 = vld [vmem:[#allocation10 + $0x38] ss:$12 sps:$4 sm:$0xff]  }
  0x7a   :  { %903 = vmatprep.subr.bf16.mxu0 %v1272_v57  ;;  %v1296_v57 = vld [vmem:[#allocation10 + $0x68] ss:$12 sps:$4 sm:$0xff]  }
  0x7c   :  { %945 = vmatpush2.bf16.msra.mxu1 %v1282_v1  ;;  %v1303_v1 = vld [vmem:[#allocation10 + $0x188] ss:$12 sps:$4 sm:$0xff]  }
  0x7d   :  { %904 = vmatpush2.bf16.msra.mxu0 %v1277_v60  ;;  %1167 = vmatprep.subr.bf16.mxu1 %v1286_v2  ;;  %v1299_v60 = vld [vmem:[#allocation10 + $0x50] ss:$12 sps:$4 sm:$0xff]   ;;  %v1304_v2 = vld [vmem:[#allocation10 + $0xe0] ss:$12 sps:$4 sm:$0xff]  }
  0x7e   :  { %995 = vmatprep.subr.bf16.mxu0 %v1424_v0 }
 0x103   :  { %v165_v3 = vpop.f32.mrf.mxu1 }
 0x105   :  { %v167_v4 = vpop.f32.mrf.mxu1 }
 0x107   :  { %v169_v6 = vpop.f32.mrf.mxu1 }
 0x108   :  { %v1308_v6 = vld [vmem:[#allocation10 + $0x8] ss:$12 sps:$4 sm:$0xff]  }
 0x109   :  { %v170_v7 = vpop.f32.mrf.mxu1 }
 0x10b   :  { %v206_v9 = vpop.f32.mrf.mxu1 }
 0x10d   :  { %v208_v10 = vpop.f32.mrf.mxu1 }
 0x10f   :  { %v210_v12 = vpop.f32.mrf.mxu1 }
 0x111   :  { %v211_v15 = vpop.f32.mrf.mxu1 }
 0x113   :  { %v271_v17 = vpop.f32.mrf.mxu1 }
 0x114   :  { %v272_v18 = vadd.f32 %v271_v17, %v165_v3  ;;  %v1305_v3 = vld [vmem:[#allocation10 + $0x20] ss:$12 sps:$4 sm:$0xff]  }
 0x115   :  { %v273_v20 = vpop.f32.mrf.mxu1 }
 0x116   :  { %v341_v21 = vadd.f32 %v324_v16, %v272_v18  ;;  %v274_v22 = vadd.f32 %v273_v20, %v167_v4  ;;  %v1306_v4 = vld [vmem:[#allocation10 + $0x248] ss:$12 sps:$4 sm:$0xff]  }
 0x117   :  { %v275_v24 = vpop.f32.mrf.mxu1 }
 0x118   :  { %v342_v26 = vadd.f32 %v328_v19, %v274_v22  ;;  %v345_v27 = vmax.f32 %v341_v21, 0.0 }
 0x119   :  { %v276_v28 = vpop.f32.mrf.mxu1 }
 0x11a   :  { %v346_v30 = vmax.f32 %v342_v26, 0.0  ;;  %v1511_v36 = vpack.c.bf16 %v345_v27, %v345_v27 }
 0x11b   :  { %v312_v31 = vpop.f32.mrf.mxu1 }
 0x11c   :  { %v313_v32 = vadd.f32 %v312_v31, %v206_v9  ;;  %v350_v34 = vpack.c.bf16 %v346_v30, %v346_v30  ;;  %v1038_v31 = vld [vmem:[%s1550_s7] sm:$0x7] }
 0x11d   :  { %v314_v37 = vpop.f32.mrf.mxu1 }
 0x11e   :  { %v343_v38 = vadd.f32 %v332_v29, %v313_v32  ;;  %v315_v39 = vadd.f32 %v314_v37, %v208_v10  ;;  %905 = vmatprep.mubr.bf16.mxu0 %v350_v34 }
 0x11f   :  { %v316_v40 = vpop.f32.mrf.mxu1  ;;  %906 = vmatmul.mubr.bf16.vlgmr.msra.gmra.mxu0 %v1511_v36 }
 0x120   :  { %v344_v41 = vadd.f32 %v336_v33, %v315_v39  ;;  %996 = vmatpush1.bf16.msra.mxu0 %v1281_v35  ;;  %v347_v43 = vmax.f32 %v343_v38, 0.0  ;;  %v1043_v38 = vrot.slane %v1038_v31, %v1499_v11 }
 0x121   :  { %v317_v44 = vpop.f32.mrf.mxu1  ;;  %997 = vmatprep.subr.bf16.mxu0 %v1424_v0 }
 0x122   :  { %v348_v45 = vmax.f32 %v344_v41, 0.0  ;;  %v351_v49 = vpack.c.bf16 %v347_v43, %v347_v43  ;;  %v1051_v41 = vrot.slane %v1038_v31, %v1508_v23 }
 0x124   :  { %v352_v46 = vpack.c.bf16 %v348_v45, %v348_v45  ;;  %998 = vmatpush1.bf16.msra.mxu0 %v1285_v42 }
 0x125   :  { %999 = vmatprep.subr.bf16.mxu0 %v1424_v0 }
 0x126   :  { %1165 = vmatprep.mubr.msk.bf16.mxu1 %vm233_vm2, %v352_v46  ;;  %1166 = vmatprep.mubr.msk.bf16.mxu0 %vm233_vm2, %v352_v46 }
 0x127   :  { %947 = vmatmul.mubr.bf16.vlgmr.msra.gmra.mxu1 %v351_v49 }
 0x128   :  { %1168 = vmatpush3.bf16.msra.mxu1 %v1287_v47  ;;  %1000 = vmatpush1.bf16.msra.mxu0 %v1288_v48 }
 0x129   :  { %987 = vmatprep.mubr.bf16.mxu1 %v350_v34  ;;  %1169 = vmatprep.subr.bf16.mxu1 %v1289_v50  ;;  %v1047_v34 = vrot.slane %v1038_v31, %v1504_v14 }
 0x12a   :  { %1001 = vmatprep.subr.bf16.mxu0 %v1424_v0 }
 0x12c   :  { %1170 = vmatpush3.bf16.msra.mxu1 %v1290_v51  ;;  %1002 = vmatpush1.bf16.msra.mxu0 %v1291_v52 }
 0x12d   :  { %1171 = vmatprep.subr.bf16.mxu1 %v1292_v53  ;;  %1003 = vmatprep.subr.bf16.mxu0 %v1424_v0 }
 0x130   :  { %1172 = vmatpush3.bf16.msra.mxu1 %v1293_v54  ;;  %1004 = vmatpush1.bf16.msra.mxu0 %v1294_v55 }
 0x131   :  { %1173 = vmatprep.subr.bf16.mxu1 %v1295_v56  ;;  %1005 = vmatprep.subr.bf16.mxu0 %v1424_v0 }
 0x134   :  { %1174 = vmatpush3.bf16.msra.mxu1 %v1296_v57  ;;  %1006 = vmatpush1.bf16.msra.mxu0 %v1297_v58 }
 0x135   :  { %1175 = vmatprep.subr.bf16.mxu1 %v1298_v59  ;;  %1007 = vmatprep.subr.bf16.mxu0 %v1424_v0 }
 0x138   :  { %1176 = vmatpush3.bf16.msra.mxu1 %v1299_v60  ;;  %1008 = vmatpush1.bf16.msra.mxu0 %v1300_v61 }
 0x139   :  { %1177 = vmatprep.subr.bf16.mxu1 %v1301_v62  ;;  %1009 = vmatprep.subr.bf16.mxu0 %v1424_v0 }
 0x13c   :  { %1178 = vmatpush3.bf16.msra.mxu1 %v1302_v63  ;;  %1010 = vmatpush1.bf16.msra.mxu0 %v1303_v1 }
 0x13d   :  { %1179 = vmatprep.subr.bf16.mxu1 %v1304_v2  ;;  %1025 = vmatprep.subr.bf16.mxu0 %v1424_v0  ;;  %v453_v0 = vld [vmem:[%s1549_s6] sm:$0x7] }
 0x13e   :  { %v462_v17 = vrot.slane %v453_v0, %v1504_v14  ;;  %v458_v18 = vrot.slane %v453_v0, %v1499_v11  ;;  %v466_v27 = vrot.slane %v453_v0, %v1508_v23  ;;  %v1065_v14 = vstv %s1551_s8 }
 0x140   :  { %1180 = vmatpush3.bf16.msra.mxu1 %v1305_v3  ;;  %1026 = vmatpush2.bf16.msra.mxu0 %v1306_v4 }
 0x141   :  { %1181 = vmatprep.subr.bf16.mxu1 %v1307_v5 }
 0x143   :  { %1028 = vmatmul.mubr.bf16.vlgmr.msra.gmra.mxu0 %v351_v49 }
 0x144   :  { %1182 = vmatpush3.bf16.msra.mxu1 %v1308_v6 }
 0x147   :  { %988 = vmatmul.mubr.bf16.vlgmr.msra.gmra.mxu1 %v1511_v36 }
 0x1df   :  { %v907_v7 = vpop.f32.mrf.mxu0 }
 0x1e0   :  { %v908_v22 = vadd.f32 %v907_v7, %v458_v18 }
 0x1e1   :  { %v909_v8 = vpop.f32.mrf.mxu0 }
 0x1e2   :  { %v910_v20 = vadd.f32 %v909_v8, %v462_v17 }
 0x1e3   :  { %v911_v9 = vpop.f32.mrf.mxu0 }
 0x1e5   :  { %v912_v10 = vpop.f32.mrf.mxu0 }
 0x1e7   :  { %v948_v12 = vpop.f32.mrf.mxu1 }
 0x1e8   :  { %v949_v28 = vadd.f32 %v948_v12, %v908_v22 }
 0x1e9   :  { %v950_v13 = vpop.f32.mrf.mxu1 }
 0x1ea   :  { %v951_v24 = vadd.f32 %v950_v13, %v910_v20  ;;  %v1035_v37 = vmax.f32 %v949_v28, 0.0 }
 0x1eb   :  { %v952_v15 = vpop.f32.mrf.mxu1 }
 0x1ec   :  { %v1036_v33 = vmax.f32 %v951_v24, 0.0  ;;  %v1055_v44 = vmul.f32 %v1043_v38, %v1035_v37 }
 0x1ed   :  { %v953_v16 = vpop.f32.mrf.mxu1 }
 0x1ee   :  { %v1056_v42 = vmul.f32 %v1047_v34, %v1036_v33 }
 0x1f0   :  { %v1058_v46 = vadd.f32 %v1056_v42, %v1055_v44 }
 0x203   :  { %v1029_v19 = vpop.f32.mrf.mxu0 }
 0x205   :  { %v1031_v21 = vpop.f32.mrf.mxu0 }
 0x207   :  { %v1183_v25 = vpop.f32.mrf.mxu1  ;;  %v1032_v26 = vpop.f32.mrf.mxu0 }
 0x209   :  { %v1184_v29 = vpop.f32.mrf.mxu1  ;;  %v1033_v30 = vpop.f32.mrf.mxu0 }
 0x20a   :  { %v1185_v32 = vadd.f32 %v1184_v29, %v1183_v25 }
 0x20b   :  { %v1186_v35 = vpop.f32.mrf.mxu1 }
 0x20c   :  { %v990_v36 = vadd.f32 %v1185_v32, %v466_v27 }
 0x20d   :  { %v1187_v39 = vpop.f32.mrf.mxu1 }
 0x20e   :  { %v1030_v40 = vadd.f32 %v1029_v19, %v990_v36 }
 0x210   :  { %v1037_v43 = vmax.f32 %v1030_v40, 0.0 }
 0x212   :  { %v1057_v45 = vmul.f32 %v1051_v41, %v1037_v43 }
 0x214   :  { %v1060_v47 = vsel %vm1059_vm3, %v1057_v45, 0.0 }
 0x215   :  { %v1061_v48 = vadd.f32 %v1060_v47, %v1058_v46 }
 0x217   :  { %1062 = vadd.xlane.f32.xlu0 %v1061_v48 }
 0x2a0   :  { %v1063_v49 = vpop.xlane.xlu0 %1062 }
 0x2a1   :  { %v1066_v11 = vadd.f32 %v1065_v14, %v1063_v49 }
 0x2a3   :  { %1068 = vst.msk [vmem:[%s1552_s9] sm:$0xff] %vm1067_vm4, %v1066_v11 }
 0x2a4   :  { %1073 = vsyncpa [#allocation4], 1 }
 0x2a5   :  { %1074 = vsyncpa [#allocation6], 1 }
 0x2a6   :  { %1075 = vsyncpa [#allocation9], 1 }

</bundles_post_ra>
